<compile_context>
chip_gen: v7x
topology: tpu7x:2x2x1
jax: 0.10.0
libtpu: 0.0.40
codegen_flags: <defaults>
</compile_context>

<pallas_src>
import functools

import jax
import jax.numpy as jnp
from jax.experimental import pallas as pl
from jax.experimental.pallas import tpu as pltpu

QMIN = 0.0    # quint8
QMAX = 255.0

_LANES = 128          # minimum lane width
_WIDE_LANES = 1024    # lane-dense last dim for large inputs (multiple of 128)
_MAX_BLOCK_ROWS = 512 # 512 x 1024 x 4B = 2 MiB per block buffer


def _round_up(x, m):
    return ((x + m - 1) // m) * m


def _choose_layout(n):
    """Pick a lane-dense (rows, cols) view + block row count for n elements."""
    cols = _WIDE_LANES if n >= _WIDE_LANES * 8 else _LANES
    rows_needed = -(-n // cols)
    block_rows = min(_MAX_BLOCK_ROWS, _round_up(rows_needed, 8))
    rows = _round_up(rows_needed, block_rows)
    return rows, cols, block_rows


def _qmul_kernel(x_ref, y_ref, o_ref, *, inv_s_l, zp_l, inv_s_r, zp_r,
                 prod_scale, s_o, zp_o):
    x = x_ref[...]
    y = y_ref[...]
    # Quantize both operands to quint8 (simulated in f32). round (half-to-even,
    # matching torch nearbyint) is applied before the zero-point add and clip.
    qx = jnp.clip(jnp.round(x * inv_s_l) + zp_l, QMIN, QMAX)
    qy = jnp.clip(jnp.round(y * inv_s_r) + zp_r, QMIN, QMAX)
    # Dequant-mul-requant with constants folded:
    #   dx*dy/s_o == (qx - zp_l)*(qy - zp_r) * (s_l*s_r/s_o) == ... * prod_scale
    qo = jnp.clip(jnp.round((qx - zp_l) * (qy - zp_r) * prod_scale) + zp_o,
                  QMIN, QMAX)
    o_ref[...] = ((qo - zp_o) * s_o).astype(o_ref.dtype)


def quantized_mul_dequant(tensor, other, *, left_scale, left_zero_point,
                          right_scale, right_zero_point, scale, zero_point):
    """dequantize(quantized.mul(quant(tensor), quant(other), scale, zero_point))."""
    out_shape = jnp.broadcast_shapes(tensor.shape, other.shape)
    x = tensor if tuple(tensor.shape) == tuple(out_shape) else jnp.broadcast_to(tensor, out_shape)
    y = other if tuple(other.shape) == tuple(out_shape) else jnp.broadcast_to(other, out_shape)
    if x.dtype != jnp.float32:
        x = x.astype(jnp.float32)
    if y.dtype != jnp.float32:
        y = y.astype(jnp.float32)

    n = 1
    for d in out_shape:
        n *= int(d)
    rows, cols, block_rows = _choose_layout(n)
    n_pad = rows * cols

    x = x.reshape(-1)
    y = y.reshape(-1)
    if n_pad != n:
        # Padded tail goes through the quantize path on zeros; sliced off below.
        x = jnp.pad(x, (0, n_pad - n))
        y = jnp.pad(y, (0, n_pad - n))
    x2 = x.reshape(rows, cols)
    y2 = y.reshape(rows, cols)

    s_l = float(left_scale)
    s_r = float(right_scale)
    s_o = float(scale)
    kernel = functools.partial(
        _qmul_kernel,
        inv_s_l=1.0 / s_l, zp_l=float(left_zero_point),
        inv_s_r=1.0 / s_r, zp_r=float(right_zero_point),
        prod_scale=(s_l * s_r) / s_o, s_o=s_o, zp_o=float(zero_point),
    )

    grid = (rows // block_rows,)
    out2 = pl.pallas_call(
        kernel,
        out_shape=jax.ShapeDtypeStruct((rows, cols), jnp.float32),
        grid_spec=pltpu.PrefetchScalarGridSpec(
            num_scalar_prefetch=0,
            grid=grid,
            in_specs=[
                pl.BlockSpec((block_rows, cols), lambda i: (i, 0)),
                pl.BlockSpec((block_rows, cols), lambda i: (i, 0)),
            ],
            out_specs=pl.BlockSpec((block_rows, cols), lambda i: (i, 0)),
        ),
        compiler_params=pltpu.CompilerParams(
            dimension_semantics=("parallel",)),
    )(x2, y2)

    out_flat = out2.reshape(-1)
    if n_pad != n:
        out_flat = out_flat[:n]
    return out_flat.reshape(out_shape)


def _reference(tensor, other, *, left_scale, left_zero_point, right_scale,
               right_zero_point, scale, zero_point):
    # Same folded-reciprocal formulation as the kernel (so the comparison is
    # exact); differs from torch's exact-divide only on .5 rounding ties.
    x = tensor.astype(jnp.float32)
    y = jnp.broadcast_to(other, tensor.shape).astype(jnp.float32)
    qx = jnp.clip(jnp.round(x * (1.0 / left_scale)) + left_zero_point, QMIN, QMAX)
    qy = jnp.clip(jnp.round(y * (1.0 / right_scale)) + right_zero_point, QMIN, QMAX)
    prod_scale = (left_scale * right_scale) / scale
    qo = jnp.clip(jnp.round((qx - left_zero_point) * (qy - right_zero_point)
                            * prod_scale) + zero_point, QMIN, QMAX)
    return (qo - zero_point) * scale


if __name__ == "__main__":
    key = jax.random.PRNGKey(0)
    k1, k2, k3, k4 = jax.random.split(key, 4)

    # Deterministic quantization parameters (mirroring the torch test's
    # per-tensor affine quint8 quantization).
    qparams = dict(
        left_scale=0.3, left_zero_point=128.0,
        right_scale=0.2, right_zero_point=120.0,
        scale=0.05, zero_point=130.0,
    )

    # Case 1: NCHW inputs, flat size tiles exactly (no pad, no broadcast copy).
    x = jax.random.uniform(k1, (2, 4, 16, 16), jnp.float32, minval=-1.0, maxval=1.0)
    other = jax.random.uniform(k2, (2, 4, 16, 16), jnp.float32, minval=-1.0, maxval=1.0)
    out = jax.block_until_ready(quantized_mul_dequant(x, other, **qparams))
    ref = _reference(x, other, **qparams)
    assert out.shape == x.shape
    assert jnp.allclose(out, ref, atol=1e-6), "mismatch vs reference (case 1)"

    # Case 2: ragged flat size -> exercises the pad + tail-slice path.
    xr = jax.random.uniform(k3, (3, 5, 17, 13), jnp.float32, minval=-1.0, maxval=1.0)
    yr = jax.random.uniform(k4, (3, 5, 17, 13), jnp.float32, minval=-1.0, maxval=1.0)
    out_r = jax.block_until_ready(quantized_mul_dequant(xr, yr, **qparams))
    ref_r = _reference(xr, yr, **qparams)
    assert out_r.shape == xr.shape
    assert jnp.allclose(out_r, ref_r, atol=1e-6), "mismatch vs reference (case 2)"

    print("KERNEL_OK")
</pallas_src>

<mosaic_0001>
module attributes {stable_mosaic.version = 11 : i64} {
  func.func @_qmul_kernel(%arg0: i32, %arg1: memref<16x128xf32, #tpu.memory_space<vmem>>, %arg2: memref<16x128xf32, #tpu.memory_space<vmem>>, %arg3: memref<16x128xf32, #tpu.memory_space<vmem>>) attributes {dimension_semantics = [#tpu.dimension_semantics<parallel>], iteration_bounds = array<i64: 1>, scalar_prefetch = 0 : i64, scratch_operands = 0 : i64, tpu.core_type = #tpu.core_type<tc>, window_params = [{transform_indices = @transform_0, window_bounds = array<i64: 16, 128>}, {transform_indices = @transform_1, window_bounds = array<i64: 16, 128>}, {transform_indices = @transform_2, window_bounds = array<i64: 16, 128>}]} {
    %c0 = arith.constant 0 : index
    %c0_0 = arith.constant 0 : index
    %0 = vector.load %arg1[%c0, %c0_0] : memref<16x128xf32, #tpu.memory_space<vmem>>, vector<16x128xf32>
    %c0_1 = arith.constant 0 : index
    %c0_2 = arith.constant 0 : index
    %1 = vector.load %arg2[%c0_1, %c0_2] : memref<16x128xf32, #tpu.memory_space<vmem>>, vector<16x128xf32>
    %cst = arith.constant 3.33333325 : f32
    %2 = vector.broadcast %cst : f32 to vector<16x128xf32>
    %3 = arith.mulf %0, %2 : vector<16x128xf32>
    %4 = math.roundeven %3 : vector<16x128xf32>
    %cst_3 = arith.constant 1.280000e+02 : f32
    %5 = vector.broadcast %cst_3 : f32 to vector<16x128xf32>
    %6 = arith.addf %4, %5 : vector<16x128xf32>
    %cst_4 = arith.constant 0.000000e+00 : f32
    %cst_5 = arith.constant 2.550000e+02 : f32
    %7 = vector.broadcast %cst_4 : f32 to vector<16x128xf32>
    %8 = arith.maximumf %7, %6 : vector<16x128xf32>
    %9 = vector.broadcast %cst_5 : f32 to vector<16x128xf32>
    %10 = arith.minimumf %9, %8 : vector<16x128xf32>
    %cst_6 = arith.constant 5.000000e+00 : f32
    %11 = vector.broadcast %cst_6 : f32 to vector<16x128xf32>
    %12 = arith.mulf %1, %11 : vector<16x128xf32>
    %13 = math.roundeven %12 : vector<16x128xf32>
    %cst_7 = arith.constant 1.200000e+02 : f32
    %14 = vector.broadcast %cst_7 : f32 to vector<16x128xf32>
    %15 = arith.addf %13, %14 : vector<16x128xf32>
    %cst_8 = arith.constant 0.000000e+00 : f32
    %cst_9 = arith.constant 2.550000e+02 : f32
    %16 = vector.broadcast %cst_8 : f32 to vector<16x128xf32>
    %17 = arith.maximumf %16, %15 : vector<16x128xf32>
    %18 = vector.broadcast %cst_9 : f32 to vector<16x128xf32>
    %19 = arith.minimumf %18, %17 : vector<16x128xf32>
    %cst_10 = arith.constant 1.280000e+02 : f32
    %20 = vector.broadcast %cst_10 : f32 to vector<16x128xf32>
    %21 = arith.subf %10, %20 : vector<16x128xf32>
    %cst_11 = arith.constant 1.200000e+02 : f32
    %22 = vector.broadcast %cst_11 : f32 to vector<16x128xf32>
    %23 = arith.subf %19, %22 : vector<16x128xf32>
    %24 = arith.mulf %21, %23 : vector<16x128xf32>
    %cst_12 = arith.constant 1.200000e+00 : f32
    %25 = vector.broadcast %cst_12 : f32 to vector<16x128xf32>
    %26 = arith.mulf %24, %25 : vector<16x128xf32>
    %27 = math.roundeven %26 : vector<16x128xf32>
    %cst_13 = arith.constant 1.300000e+02 : f32
    %28 = vector.broadcast %cst_13 : f32 to vector<16x128xf32>
    %29 = arith.addf %27, %28 : vector<16x128xf32>
    %cst_14 = arith.constant 0.000000e+00 : f32
    %cst_15 = arith.constant 2.550000e+02 : f32
    %30 = vector.broadcast %cst_14 : f32 to vector<16x128xf32>
    %31 = arith.maximumf %30, %29 : vector<16x128xf32>
    %32 = vector.broadcast %cst_15 : f32 to vector<16x128xf32>
    %33 = arith.minimumf %32, %31 : vector<16x128xf32>
    %cst_16 = arith.constant 1.300000e+02 : f32
    %34 = vector.broadcast %cst_16 : f32 to vector<16x128xf32>
    %35 = arith.subf %33, %34 : vector<16x128xf32>
    %cst_17 = arith.constant 5.000000e-02 : f32
    %36 = vector.broadcast %cst_17 : f32 to vector<16x128xf32>
    %37 = arith.mulf %35, %36 : vector<16x128xf32>
    %c0_18 = arith.constant 0 : index
    %c0_19 = arith.constant 0 : index
    %38 = vector.load %arg3[%c0_18, %c0_19] : memref<16x128xf32, #tpu.memory_space<vmem>>, vector<16x128xf32>
    tpu.vector_store %arg3[%c0_18, %c0_19], %37 {strides = array<i32>} : memref<16x128xf32, #tpu.memory_space<vmem>>, vector<16x128xf32>,
    return
  }
  func.func @transform_0(%arg0: i32) -> (i32, i32) {
    %c0_i32 = arith.constant 0 : i32
    %c0_i32_0 = arith.constant 0 : i32
    return %arg0, %c0_i32 : i32, i32
  }
  func.func @transform_1(%arg0: i32) -> (i32, i32) {
    %c0_i32 = arith.constant 0 : i32
    %c0_i32_0 = arith.constant 0 : i32
    return %arg0, %c0_i32 : i32, i32
  }
  func.func @transform_2(%arg0: i32) -> (i32, i32) {
    %c0_i32 = arith.constant 0 : i32
    %c0_i32_0 = arith.constant 0 : i32
    return %arg0, %c0_i32 : i32, i32
  }
}

</mosaic_0001>

<bundles_post_ra>
// kernel: tpu_custom_call.1
= control target key start
LH: loop header
LB: loop body
LE: loop exit
PB: predicated region body
PF: predicated region fallthrough
CT: control target
= control target key end

     0   :  { %7 = vsyncpa [#allocation3], 0  ;;  %s258_s0 = inlined_call_operand.hbm [shape: f32[16,128], index: 0, kind: input, shape index: {}]   ;;  %s259_s1 = inlined_call_operand.hbm [shape: f32[16,128], index: 1, kind: input, shape index: {}]   ;;  %s260_s2 = inlined_call_operand.hbm [shape: f32[16,128], index: 2, kind: output, shape index: {}]  }
   0x1   :  { %8 = vsyncpa [#allocation6], 0 }
   0x2   :  { %9 = vsyncpa [#allocation4], 0  ;;  %s193_s9 = smov [#allocation2]   ;;  %s121_s13 = scalar_lea.hbm %s258_s0, 256 }
   0x3   :  { %s15_s10 = sshll.u32 %s193_s9, 4  ;;  %p122_p0 = scmp.ne.s32.totalorder %s258_s0, %s121_s13  ;;  %s16_s10 = int_to_ptr.vmem [resolvable:$true] %s15_s10 }
   0x4   :  { %p125_p1 = scmp.lt.u32.totalorder %s121_s13, %s258_s0 }
   0x6   :  { %p127_p2 = pnand %p125_p1, %p122_p0 }
   0x8   :  { %130 = shalt.err (!%p127_p2)
}
   0x9   :  { %s131_s18 = scalar_lea.vmem %s16_s10, 256  ;;  %p136_p4 = scmp.lt.s32.totalorder %s16_s10, %s16_s10 }
   0xa   :  { %p132_p3 = scmp.ne.s32.totalorder %s16_s10, %s131_s18  ;;  %p137_p5 = scmp.lt.s32.totalorder %s131_s18, %s131_s18 }
   0xc   :  { %p138_p6 = por %p137_p5, %p136_p4 }
   0xe   :  { %p139_p7 = pnand %p138_p6, %p132_p3 }
  0x10   :  { %142 = shalt.err (!%p139_p7)
}
  0x11   :  { %s194_s19 = smov 128   ;;  %s195_s20 = smov 8  }
  0x12   :  { %21 = dma.hbm_to_vmem [thread:$0]  %s258_s0, 256, %s16_s10, [#allocation3], %s194_s19, %s194_s19, %s195_s20  }
  0x13   :  { %s196_s23 = smov [#allocation5]   ;;  %s143_s27 = scalar_lea.hbm %s259_s1, 256 }
  0x14   :  { %s27_s24 = sshll.u32 %s196_s23, 4  ;;  %p144_p8 = scmp.ne.s32.totalorder %s259_s1, %s143_s27  ;;  %s28_s24 = int_to_ptr.vmem [resolvable:$true] %s27_s24 }
  0x15   :  { %p147_p9 = scmp.lt.u32.totalorder %s143_s27, %s259_s1 }
  0x17   :  { %p149_p10 = pnand %p147_p9, %p144_p8 }
  0x19   :  { %152 = shalt.err (!%p149_p10)
}
  0x1a   :  { %s153_s4 = scalar_lea.vmem %s28_s24, 256  ;;  %p158_p12 = scmp.lt.s32.totalorder %s28_s24, %s28_s24 }
  0x1b   :  { %p154_p11 = scmp.ne.s32.totalorder %s28_s24, %s153_s4  ;;  %p159_p13 = scmp.lt.s32.totalorder %s153_s4, %s153_s4 }
  0x1d   :  { %p160_p0 = por %p159_p13, %p158_p12 }
  0x1f   :  { %p161_p1 = pnand %p160_p0, %p154_p11 }
  0x21   :  { %164 = shalt.err (!%p161_p1)
}
  0x22   :  { %33 = dma.hbm_to_vmem [thread:$0]  %s259_s1, 256, %s28_s24, [#allocation6], %s194_s19, %s194_s19, %s195_s20  }
  0x23   :  { %187 = dma.done.wait [#allocation3], 256  }
  0x24   :  { %188 = vsyncadd [#allocation3], 4294967040 }
  0x25   :  { %189 = dma.done.wait [#allocation6], 256  }
  0x26   :  { %190 = vsyncadd [#allocation6], 4294967040  ;;  %v40_v0 = vld [vmem:[#allocation2] sm:$0xff]  ;;  %v42_v1 = vld [vmem:[#allocation5] sm:$0xff]  ;;  %s197_s1 = smov [#allocation7]  }
  0x27   :  { %v41_v2 = vld [vmem:[#allocation2 + $0x8] sm:$0xff]  ;;  %v44_v3 = vmul.f32 3.3333333, %v40_v0  ;;  %v54_v4 = vmul.f32 5.0, %v42_v1  ;;  %v43_v5 = vld [vmem:[#allocation5 + $0x8] sm:$0xff]  ;;  %s91_s6 = sshll.u32 %s197_s1, 4  ;;  %s92_s6 = int_to_ptr.vmem [resolvable:$true] %s91_s6 }
  0x28   :  { %v45_v6 = vmul.f32 3.3333333, %v41_v2  ;;  %v55_v7 = vmul.f32 5.0, %v43_v5  ;;  %s165_s7 = scalar_lea.vmem %s92_s6, 256  ;;  %p170_p3 = scmp.lt.s32.totalorder %s92_s6, %s92_s6 }
  0x29   :  { %v110_v8 = vround.rtne.f32 %v44_v3  ;;  %v112_v9 = vround.rtne.f32 %v54_v4  ;;  %p166_p2 = scmp.ne.s32.totalorder %s92_s6, %s165_s7  ;;  %p171_p4 = scmp.lt.s32.totalorder %s165_s7, %s165_s7 }
  0x2a   :  { %v111_v10 = vround.rtne.f32 %v45_v6  ;;  %v113_v11 = vround.rtne.f32 %v55_v7 }
  0x2b   :  { %v48_v12 = vadd.f32 128.0, %v110_v8  ;;  %v58_v13 = vadd.f32 120.0, %v112_v9  ;;  %p172_p5 = por %p171_p4, %p170_p3 }
  0x2c   :  { %v49_v14 = vadd.f32 128.0, %v111_v10  ;;  %v59_v15 = vadd.f32 120.0, %v113_v11 }
  0x2d   :  { %v50_v16 = vmax.f32 %v48_v12, 0.0  ;;  %v60_v17 = vmax.f32 %v58_v13, 0.0  ;;  %p173_p6 = pnand %p172_p5, %p166_p2 }
  0x2e   :  { %v51_v18 = vmax.f32 %v49_v14, 0.0  ;;  %v61_v19 = vmax.f32 %v59_v15, 0.0 }
  0x2f   :  { %v52_v20 = vmin.f32 %v50_v16, 255.0  ;;  %v62_v21 = vmin.f32 %v60_v17, 255.0 }
  0x30   :  { %v53_v22 = vmin.f32 %v51_v18, 255.0  ;;  %v63_v23 = vmin.f32 %v61_v19, 255.0 }
  0x31   :  { %v104_v24 = vadd.f32 -128.0, %v52_v20  ;;  %v106_v25 = vadd.f32 -120.0, %v62_v21 }
  0x32   :  { %v105_v26 = vadd.f32 -128.0, %v53_v22  ;;  %v107_v27 = vadd.f32 -120.0, %v63_v23 }
  0x33   :  { %v68_v28 = vmul.f32 %v106_v25, %v104_v24 }
  0x34   :  { %v69_v29 = vmul.f32 %v107_v27, %v105_v26 }
  0x35   :  { %v70_v30 = vmul.f32 1.2, %v68_v28 }
  0x36   :  { %v71_v31 = vmul.f32 1.2, %v69_v29 }
  0x37   :  { %v114_v32 = vround.rtne.f32 %v70_v30 }
  0x38   :  { %v115_v33 = vround.rtne.f32 %v71_v31 }
  0x39   :  { %v74_v34 = vadd.f32 130.0, %v114_v32 }
  0x3a   :  { %v75_v35 = vadd.f32 130.0, %v115_v33 }
  0x3b   :  { %v76_v36 = vmax.f32 %v74_v34, 0.0 }
  0x3c   :  { %v77_v37 = vmax.f32 %v75_v35, 0.0 }
  0x3d   :  { %v78_v38 = vmin.f32 %v76_v36, 255.0 }
  0x3e   :  { %v79_v39 = vmin.f32 %v77_v37, 255.0 }
  0x3f   :  { %v108_v40 = vadd.f32 -130.0, %v78_v38 }
  0x40   :  { %v109_v41 = vadd.f32 -130.0, %v79_v39 }
  0x41   :  { %v82_v42 = vmul.f32 0.05, %v108_v40 }
  0x42   :  { %v83_v43 = vmul.f32 0.05, %v109_v41 }
  0x43   :  { %84 = vst [vmem:[#allocation7] sm:$0xff] %v82_v42 }
  0x44   :  { %85 = vst [vmem:[#allocation7 + $0x8] sm:$0xff] %v83_v43 }
  0x45   :  { %176 = shalt.err (!%p173_p6)
}
  0x46   :  { %s177_s10 = scalar_lea.hbm %s260_s2, 256 }
  0x47   :  { %p178_p7 = scmp.ne.s32.totalorder %s260_s2, %s177_s10  ;;  %p181_p8 = scmp.lt.u32.totalorder %s177_s10, %s260_s2 }
  0x49   :  { %p183_p9 = pnand %p181_p8, %p178_p7 }
  0x4b   :  { %186 = shalt.err (!%p183_p9)
}
  0x4c   :  { %97 = dma.vmem_to_hbm [thread:$0]  %s92_s6, 256, %s260_s2, [#allocation4], %s194_s19, %s194_s19, %s195_s20  }
  0x4d   :  { %191 = dma.done.wait [#allocation4], 256  }
  0x4e   :  { %192 = vsyncadd [#allocation4], 4294967040 }
  0x4f   :  { %101 = vsyncpa [#allocation3], 1 }
  0x50   :  { %102 = vsyncpa [#allocation6], 1 }
  0x51   :  { %103 = vsyncpa [#allocation4], 1 }

</bundles_post_ra>
